<compile_context>
chip_gen: v7x
topology: tpu7x:2x2x1
jax: 0.10.0
libtpu: 0.0.40
codegen_flags: <defaults>
</compile_context>

<pallas_src>
import functools

import jax
import jax.numpy as jnp
from jax.experimental import pallas as pl
from jax.experimental.pallas import tpu as pltpu

C = 26             # number of emotion categories (fixed by the module)
LANES = 128        # TPU lane width
ROW_ALIGN = 104    # lcm(13, 8): weight period (13 rows) x sublane alignment (8)
MAX_BLOCK_ROWS = 832        # 8 * ROW_ALIGN -> 416 KiB per f32 input block
PALLAS_MIN_ELEMS = 4096     # below this, fused XLA beats kernel dispatch cost


def _round_up(x: int, m: int) -> int:
    return ((x + m - 1) // m) * m


def make_weights(weight_type: str = "mean", target=None) -> jnp.ndarray:
    """(1, C) per-class weights, matching the PyTorch module."""
    if weight_type == "mean":
        return jnp.ones((1, C), jnp.float32) / float(C)
    elif weight_type == "static":
        static = jnp.array(
            [0.1435, 0.187, 0.1692, 0.1165, 0.1949, 0.1204, 0.1728, 0.1372,
             0.162, 0.154, 0.1987, 0.1057, 0.1482, 0.1192, 0.159, 0.1929,
             0.1158, 0.1907, 0.1345, 0.1307, 0.1665, 0.1698, 0.1797, 0.1657,
             0.152, 0.1537], dtype=jnp.float32)
        return static[None, :]
    elif weight_type == "dynamic":
        # prepare_dynamic_weights(target): tiny (1, C) reduction, plain-JAX glue.
        stats = jnp.sum(target.astype(jnp.float32), axis=0, keepdims=True)
        return jnp.where(stats != 0.0, 1.0 / jnp.log(stats + 1.2),
                         jnp.float32(1e-4))
    raise ValueError(f"unknown weight_type: {weight_type}")


def _bce_tile_kernel(pred_ref, target_ref, w_ref, out_ref, *,
                     block_rows: int, flat_len: int, need_mask: bool):
    """One lane-dense (block_rows, 128) tile -> (8, 128) partial sums."""
    x = pred_ref[...].astype(jnp.float32)
    t = target_ref[...].astype(jnp.float32)
    w = w_ref[...]                                   # f32 periodic weight tile

    # Numerically stable BCE-with-logits (same form torch uses):
    #   max(x, 0) - x*t + log1p(exp(-|x|))
    loss = jnp.maximum(x, 0.0) - x * t + jnp.log1p(jnp.exp(-jnp.abs(x)))
    weighted = loss * w

    if need_mask:
        # Zero the zero-padded tail (only compiled in when B*C isn't a multiple
        # of the block size); a few VPU ops per vreg, hidden behind HBM/EUP.
        block_elems = block_rows * LANES
        row = jax.lax.broadcasted_iota(jnp.int32, (block_rows, LANES), 0)
        lane = jax.lax.broadcasted_iota(jnp.int32, (block_rows, LANES), 1)
        gidx = pl.program_id(0) * block_elems + row * LANES + lane
        weighted = jnp.where(gidx < flat_len, weighted, 0.0)

    # Sublane-only partial reduce: (tiles, 8, 128) -> (8, 128). Pure VPU adds,
    # lane-dense tile-aligned store; the cross-lane reduce of the tiny partials
    # array is left to XLA outside.
    out_ref[...] = jnp.sum(weighted.reshape(block_rows // 8, 8, LANES), axis=0)


def _bce_reference(pred, target, weights):
    x = pred.astype(jnp.float32)
    t = target.astype(jnp.float32)
    loss = jnp.maximum(x, 0.0) - x * t + jnp.log1p(jnp.exp(-jnp.abs(x)))
    return jnp.sum(loss * weights)


def bce_with_logits_loss(pred, target, weight_type="mean", use_pallas=None):
    """Weighted-sum BCEWithLogits loss.  Hot path (BCE + weighting + bulk
    reduction) runs in a lane-dense, batch-tiled Pallas kernel."""
    assert pred.shape == target.shape and pred.shape[-1] == C
    B = pred.shape[0]
    flat_len = B * C
    weights = make_weights(weight_type, target)      # (1, C) f32

    if use_pallas is None:
        use_pallas = flat_len >= PALLAS_MIN_ELEMS
    if not use_pallas:
        # Tiny batches: custom-call dispatch overhead dwarfs the compute.
        return _bce_reference(pred, target, weights)

    # ---- lane-dense tiling --------------------------------------------------
    rows_needed = pl.cdiv(flat_len, LANES)
    block_rows = min(MAX_BLOCK_ROWS, _round_up(rows_needed, ROW_ALIGN))
    block_elems = block_rows * LANES
    num_blocks = pl.cdiv(flat_len, block_elems)
    padded_len = num_blocks * block_elems
    need_mask = padded_len != flat_len

    pred_flat = pred.reshape(-1)
    target_flat = target.reshape(-1)
    if need_mask:
        pad = padded_len - flat_len
        pred_flat = jnp.pad(pred_flat, (0, pad))
        target_flat = jnp.pad(target_flat, (0, pad))
    pred2 = pred_flat.reshape(num_blocks * block_rows, LANES)
    target2 = target_flat.reshape(num_blocks * block_rows, LANES)

    # Periodic weight tile: flat element j has weight weights[0, j % 26]; the
    # pattern repeats every lcm(26, 128) = 1664 elements = 13 rows, and every
    # block starts at a multiple of 1664, so one (block_rows, 128) tile serves
    # all blocks (index_map pinned to (0, 0) -> fetched once, VMEM-resident).
    w_block = jnp.tile(weights.reshape(-1),
                       block_elems // C).reshape(block_rows, LANES)

    kernel = functools.partial(_bce_tile_kernel, block_rows=block_rows,
                               flat_len=flat_len, need_mask=need_mask)

    itemsize = jnp.dtype(pred.dtype).itemsize
    cost = pl.CostEstimate(
        flops=8 * padded_len,
        transcendentals=2 * padded_len,
        bytes_accessed=(2 * padded_len * itemsize      # pred + target streams
                        + block_elems * 4              # weight tile
                        + num_blocks * 8 * LANES * 4), # partial sums out
    )

    partials = pl.pallas_call(
        kernel,
        out_shape=jax.ShapeDtypeStruct((num_blocks * 8, LANES), jnp.float32),
        grid_spec=pltpu.PrefetchScalarGridSpec(
            num_scalar_prefetch=0,
            grid=(num_blocks,),
            in_specs=[
                pl.BlockSpec((block_rows, LANES), lambda i: (i, 0)),  # pred
                pl.BlockSpec((block_rows, LANES), lambda i: (i, 0)),  # target
                pl.BlockSpec((block_rows, LANES), lambda i: (0, 0)),  # weights
            ],
            out_specs=pl.BlockSpec((8, LANES), lambda i: (i, 0)),
        ),
        compiler_params=pltpu.CompilerParams(
            dimension_semantics=("parallel",),   # v7x: shard grid over both TCs
            vmem_limit_bytes=32 * 1024 * 1024,
        ),
        cost_estimate=cost,
    )(pred2, target2, w_block)

    # Tiny final reduction over (num_blocks*8, 128) partials stays in XLA.
    return jnp.sum(partials)


if __name__ == "__main__":
    key = jax.random.PRNGKey(0)
    k1, k2, k3, k4 = jax.random.split(key, 4)

    # 1) tiny batch: auto-dispatch takes the fused-XLA path (kernel dispatch
    #    overhead would dominate at ~200 elements).
    B = 8
    pred_s = jax.random.normal(k1, (B, C), dtype=jnp.float32)
    target_s = (jax.random.uniform(k2, (B, C)) > 0.5).astype(jnp.float32)
    out_auto = jax.block_until_ready(bce_with_logits_loss(pred_s, target_s, "mean"))
    ref_s = _bce_reference(pred_s, target_s, make_weights("mean"))
    assert jnp.allclose(out_auto, ref_s, rtol=1e-5, atol=1e-5), (out_auto, ref_s)

    # 2) same tiny batch forced through the Pallas kernel (exercises the
    #    pad + remainder-mask path).
    out_k = jax.block_until_ready(
        bce_with_logits_loss(pred_s, target_s, "mean", use_pallas=True))
    assert jnp.allclose(out_k, ref_s, rtol=1e-4, atol=1e-4), (out_k, ref_s)

    # 3) larger batch, bf16 inputs, static + dynamic weights -> kernel path.
    B = 256
    pred_l = jax.random.normal(k3, (B, C), dtype=jnp.bfloat16)
    target_l = (jax.random.uniform(k4, (B, C)) > 0.5).astype(jnp.bfloat16)
    for wt in ("static", "dynamic"):
        out_l = jax.block_until_ready(bce_with_logits_loss(pred_l, target_l, wt))
        ref_l = _bce_reference(pred_l, target_l, make_weights(wt, target_l))
        assert jnp.allclose(out_l, ref_l, rtol=1e-3, atol=1e-3), (wt, out_l, ref_l)

    print("KERNEL_OK")
</pallas_src>

<mosaic_0001>
module attributes {stable_mosaic.version = 11 : i64} {
  func.func @_bce_tile_kernel(%arg0: i32, %arg1: memref<104x128xf32, #tpu.memory_space<vmem>>, %arg2: memref<104x128xf32, #tpu.memory_space<vmem>>, %arg3: memref<104x128xf32, #tpu.memory_space<vmem>>, %arg4: memref<8x128xf32, #tpu.memory_space<vmem>>) attributes {dimension_semantics = [#tpu.dimension_semantics<parallel>], iteration_bounds = array<i64: 1>, scalar_prefetch = 0 : i64, scratch_operands = 0 : i64, tpu.core_type = #tpu.core_type<tc>, window_params = [{transform_indices = @transform_0, window_bounds = array<i64: 104, 128>}, {transform_indices = @transform_1, window_bounds = array<i64: 104, 128>}, {pipeline_mode = #tpu.pipeline_mode<synchronous>, transform_indices = @transform_2, window_bounds = array<i64: 104, 128>}, {transform_indices = @transform_3, window_bounds = array<i64: 8, 128>}]} {
    %c0 = arith.constant 0 : index
    %c0_0 = arith.constant 0 : index
    %0 = vector.load %arg1[%c0, %c0_0] : memref<104x128xf32, #tpu.memory_space<vmem>>, vector<104x128xf32>
    %c0_1 = arith.constant 0 : index
    %c0_2 = arith.constant 0 : index
    %1 = vector.load %arg2[%c0_1, %c0_2] : memref<104x128xf32, #tpu.memory_space<vmem>>, vector<104x128xf32>
    %c0_3 = arith.constant 0 : index
    %c0_4 = arith.constant 0 : index
    %2 = vector.load %arg3[%c0_3, %c0_4] : memref<104x128xf32, #tpu.memory_space<vmem>>, vector<104x128xf32>
    %cst = arith.constant 0.000000e+00 : f32
    %3 = vector.broadcast %cst : f32 to vector<104x128xf32>
    %4 = arith.maximumf %0, %3 : vector<104x128xf32>
    %5 = arith.mulf %0, %1 : vector<104x128xf32>
    %6 = arith.subf %4, %5 : vector<104x128xf32>
    %7 = math.absf %0 : vector<104x128xf32>
    %cst_5 = arith.constant 0.000000e+00 : f32
    %8 = vector.broadcast %cst_5 : f32 to vector<104x128xf32>
    %9 = arith.subf %8, %7 : vector<104x128xf32>
    %10 = math.exp %9 : vector<104x128xf32>
    %11 = math.log1p %10 : vector<104x128xf32>
    %12 = arith.addf %6, %11 : vector<104x128xf32>
    %13 = arith.mulf %12, %2 : vector<104x128xf32>
    %14 = tpu.iota {dimensions = array<i32: 0>} : vector<104x128xi32>
    %15 = tpu.iota {dimensions = array<i32: 1>} : vector<104x128xi32>
    %c13312_i32 = arith.constant 13312 : i32
    %16 = arith.muli %arg0, %c13312_i32 : i32
    %c128_i32 = arith.constant 128 : i32
    %17 = vector.broadcast %c128_i32 : i32 to vector<104x128xi32>
    %18 = arith.muli %14, %17 : vector<104x128xi32>
    %19 = vector.broadcast %16 : i32 to vector<104x128xi32>
    %20 = arith.addi %19, %18 : vector<104x128xi32>
    %21 = arith.addi %20, %15 : vector<104x128xi32>
    %c208_i32 = arith.constant 208 : i32
    %22 = vector.broadcast %c208_i32 : i32 to vector<104x128xi32>
    %23 = arith.cmpi slt, %21, %22 : vector<104x128xi32>
    %cst_6 = arith.constant 0.000000e+00 : f32
    %24 = vector.broadcast %cst_6 : f32 to vector<104x128xf32>
    %25 = arith.select %23, %13, %24 : vector<104x128xi1>, vector<104x128xf32>
    %26 = vector.shape_cast %25 : vector<104x128xf32> to vector<13x8x128xf32>
    %cst_7 = arith.constant dense<0.000000e+00> : vector<8x128xf32>
    %27 = vector.multi_reduction <add>, %26, %cst_7 [0] : vector<13x8x128xf32> to vector<8x128xf32>
    %c0_8 = arith.constant 0 : index
    %c0_9 = arith.constant 0 : index
    %28 = vector.load %arg4[%c0_8, %c0_9] : memref<8x128xf32, #tpu.memory_space<vmem>>, vector<8x128xf32>
    tpu.vector_store %arg4[%c0_8, %c0_9], %27 {strides = array<i32>} : memref<8x128xf32, #tpu.memory_space<vmem>>, vector<8x128xf32>,
    return
  }
  func.func @transform_0(%arg0: i32) -> (i32, i32) {
    %c0_i32 = arith.constant 0 : i32
    %c0_i32_0 = arith.constant 0 : i32
    return %arg0, %c0_i32 : i32, i32
  }
  func.func @transform_1(%arg0: i32) -> (i32, i32) {
    %c0_i32 = arith.constant 0 : i32
    %c0_i32_0 = arith.constant 0 : i32
    return %arg0, %c0_i32 : i32, i32
  }
  func.func @transform_2(%arg0: i32) -> (i32, i32) {
    %c0_i32 = arith.constant 0 : i32
    %c0_i32_0 = arith.constant 0 : i32
    %c0_i32_1 = arith.constant 0 : i32
    return %c0_i32, %c0_i32_0 : i32, i32
  }
  func.func @transform_3(%arg0: i32) -> (i32, i32) {
    %c0_i32 = arith.constant 0 : i32
    %c0_i32_0 = arith.constant 0 : i32
    return %arg0, %c0_i32 : i32, i32
  }
}

</mosaic_0001>

<bundles_post_ra>
// kernel: tpu_custom_call.1
= control target key start
LH: loop header
LB: loop body
LE: loop exit
PB: predicated region body
PF: predicated region fallthrough
CT: control target
= control target key end

     0   :  { %8 = vsyncpa [#allocation3], 0  ;;  %s1077_s0 = inlined_call_operand.hbm [shape: f32[104,128], index: 0, kind: input, shape index: {}]   ;;  %s1078_s1 = inlined_call_operand.hbm [shape: f32[104,128], index: 1, kind: input, shape index: {}]   ;;  %s1079_s2 = inlined_call_operand.hbm [shape: f32[104,128], index: 2, kind: input, shape index: {}]   ;;  %s1080_s3 = inlined_call_operand.hbm [shape: f32[8,128], index: 3, kind: output, shape index: {}]  }
   0x1   :  { %9 = vsyncpa [#allocation6], 0 }
   0x2   :  { %10 = vsyncpa [#allocation4], 0  ;;  %s593_s12 = smov [#allocation5]   ;;  %s594_s14 = smov [#allocation2]  }
   0x3   :  { %s28_s13 = sshll.u32 %s593_s12, 4  ;;  %s16_s15 = sshll.u32 %s594_s14, 4  ;;  %s29_s13 = int_to_ptr.vmem [resolvable:$true] %s28_s13  ;;  %s619_s15 = int_to_ptr.vmem [resolvable:$true] %s16_s15 }
   0x4   :  { %s499_s18 = scalar_lea.hbm %s1078_s1, 1664 }
   0x5   :  { %p500_p0 = scmp.ne.s32.totalorder %s1078_s1, %s499_s18  ;;  %p503_p1 = scmp.lt.u32.totalorder %s499_s18, %s1078_s1 }
   0x7   :  { %p505_p2 = pnand %p503_p1, %p500_p0 }
   0x9   :  { %508 = shalt.err (!%p505_p2)
}
   0xa   :  { %s509_s23 = scalar_lea.vmem %s29_s13, 1664  ;;  %p514_p4 = scmp.lt.s32.totalorder %s29_s13, %s29_s13 }
   0xb   :  { %p510_p3 = scmp.ne.s32.totalorder %s29_s13, %s509_s23  ;;  %p515_p5 = scmp.lt.s32.totalorder %s509_s23, %s509_s23 }
   0xd   :  { %p516_p6 = por %p515_p5, %p514_p4 }
   0xf   :  { %p517_p7 = pnand %p516_p6, %p510_p3 }
  0x11   :  { %520 = shalt.err (!%p517_p7)
}
  0x12   :  { %s595_s24 = smov 128   ;;  %s596_s25 = smov 8  }
  0x13   :  { %34 = dma.hbm_to_vmem [thread:$0]  %s1078_s1, 1664, %s29_s13, [#allocation6], %s595_s24, %s595_s24, %s596_s25  }
  0x14   :  { %s521_s30 = scalar_lea.hbm %s1077_s0, 1664 }
  0x15   :  { %p522_p8 = scmp.ne.s32.totalorder %s1077_s0, %s521_s30  ;;  %p525_p9 = scmp.lt.u32.totalorder %s521_s30, %s1077_s0 }
  0x17   :  { %p527_p10 = pnand %p525_p9, %p522_p8 }
  0x19   :  { %530 = shalt.err (!%p527_p10)
}
  0x1a   :  { %s531_s8 = scalar_lea.vmem %s619_s15, 1664  ;;  %p536_p12 = scmp.lt.s32.totalorder %s619_s15, %s619_s15 }
  0x1b   :  { %p532_p11 = scmp.ne.s32.totalorder %s619_s15, %s531_s8  ;;  %p537_p13 = scmp.lt.s32.totalorder %s531_s8, %s531_s8 }
  0x1d   :  { %p538_p0 = por %p537_p13, %p536_p12 }
  0x1f   :  { %p539_p1 = pnand %p538_p0, %p532_p11 }
  0x21   :  { %542 = shalt.err (!%p539_p1)
}
  0x22   :  { %22 = dma.hbm_to_vmem [thread:$0]  %s1077_s0, 1664, %s619_s15, [#allocation3], %s595_s24, %s595_s24, %s596_s25  }
  0x23   :  { %s597_s10 = smov [#allocation7]   ;;  %s543_s14 = scalar_lea.hbm %s1079_s2, 1664 }
  0x24   :  { %s40_s11 = sshll.u32 %s597_s10, 4  ;;  %p544_p2 = scmp.ne.s32.totalorder %s1079_s2, %s543_s14  ;;  %s41_s11 = int_to_ptr.vmem [resolvable:$true] %s40_s11 }
  0x25   :  { %p547_p3 = scmp.lt.u32.totalorder %s543_s14, %s1079_s2 }
  0x27   :  { %p549_p4 = pnand %p547_p3, %p544_p2 }
  0x29   :  { %552 = shalt.err (!%p549_p4)
}
  0x2a   :  { %s553_s20 = scalar_lea.vmem %s41_s11, 1664  ;;  %p558_p6 = scmp.lt.s32.totalorder %s41_s11, %s41_s11 }
  0x2b   :  { %p554_p5 = scmp.ne.s32.totalorder %s41_s11, %s553_s20  ;;  %p559_p7 = scmp.lt.s32.totalorder %s553_s20, %s553_s20 }
  0x2d   :  { %p560_p8 = por %p559_p7, %p558_p6 }
  0x2f   :  { %p561_p9 = pnand %p560_p8, %p554_p5 }
  0x31   :  { %564 = shalt.err (!%p561_p9)
}
  0x32   :  { %46 = dma.hbm_to_vmem [thread:$0]  %s1079_s2, 1664, %s41_s11, [#allocation6], %s595_s24, %s595_s24, %s596_s25  }
  0x33   :  { %587 = dma.done.wait [#allocation3], 1664  }
  0x34   :  { %588 = vsyncadd [#allocation3], 4294965632 }
  0x35   :  { %589 = dma.done.wait [#allocation6], 3328  }
  0x36   :  { %590 = vsyncadd [#allocation6], 4294963968  ;;  %v329_v0 = vlaneseq  ;;  %v671_v2 = vld [vmem:[#allocation2] sm:$0xff]  ;;  %v673_v3 = vld [vmem:[#allocation2 + $0x8] sm:$0xff]  ;;  %s598_s2 = smov [#allocation8]  }
  0x37   :  { %v683_v9 = vld [vmem:[#allocation2 + $0x10] sm:$0xff]  ;;  %v134_v10 = vand.u32 2147483647, %v671_v2  ;;  %v135_v14 = vand.u32 2147483647, %v673_v3  ;;  %v699_v18 = vld [vmem:[#allocation2 + $0x18] sm:$0xff] }
  0x38   :  { %v330_v1 = vshrl.u32 %v329_v0, 7  ;;  %v681_v8 = vand.u32 127, %v329_v0  ;;  %v701_v19 = vld [vmem:[#allocation2 + $0x20] sm:$0xff]  ;;  %v707_v24 = vld [vmem:[#allocation2 + $0x28] sm:$0xff]  ;;  %v95_v25 = vmax.f32 %v671_v2, 0.0  ;;  %v96_v26 = vmax.f32 %v673_v3, 0.0 }
  0x39   :  { %v97_v27 = vmax.f32 %v683_v9, 0.0  ;;  %v136_v28 = vand.u32 2147483647, %v683_v9  ;;  %v713_v29 = vld [vmem:[#allocation2 + $0x30] sm:$0xff]  ;;  %v715_v30 = vld [vmem:[#allocation2 + $0x38] sm:$0xff]  ;;  %v717_v31 = vld [vmem:[#allocation2 + $0x40] sm:$0xff] }
  0x3a   :  { %v331_v4 = vadd.s32 8, %v330_v1  ;;  %v675_v5 = vadd.s32 16, %v330_v1  ;;  %v677_v6 = vadd.s32 24, %v330_v1  ;;  %v679_v7 = vadd.s32 32, %v330_v1  ;;  %v721_v35 = vld [vmem:[#allocation2 + $0x48] sm:$0xff]  ;;  %v723_v36 = vld [vmem:[#allocation2 + $0x50] sm:$0xff] }
  0x3b   :  { %v686_v11 = vadd.s32 40, %v330_v1  ;;  %v688_v12 = vadd.s32 48, %v330_v1  ;;  %v690_v13 = vadd.s32 56, %v330_v1  ;;  %v693_v15 = vadd.s32 64, %v330_v1  ;;  %v727_v40 = vld [vmem:[#allocation2 + $0x58] sm:$0xff]  ;;  %v69_v41 = vld [vmem:[#allocation5] sm:$0xff] }
  0x3c   :  { %v695_v16 = vadd.s32 72, %v330_v1  ;;  %v697_v17 = vadd.s32 80, %v330_v1  ;;  %v703_v20 = vadd.s32 88, %v330_v1  ;;  %v705_v21 = vadd.s32 96, %v330_v1  ;;  %v70_v42 = vld [vmem:[#allocation5 + $0x8] sm:$0xff]  ;;  %v732_v46 = vld [vmem:[#allocation2 + $0x60] sm:$0xff] }
  0x3d   :  { %v346_v22 = vmul.u32 128, %v330_v1  ;;  %v347_v23 = vmul.u32 128, %v331_v4  ;;  %v98_v32 = vmax.f32 %v699_v18, 0.0  ;;  %v99_v33 = vmax.f32 %v701_v19, 0.0  ;;  %v71_v47 = vld [vmem:[#allocation5 + $0x10] sm:$0xff]  ;;  %v72_v52 = vld [vmem:[#allocation5 + $0x18] sm:$0xff] }
  0x3e   :  { %1082 = vst [vmem:[#allocation12_spill] sm:$0xff] %v703_v20  ;;  %v147_v34 = vsub.f32 0.0, %v134_v10  ;;  %v100_v37 = vmax.f32 %v707_v24, 0.0  ;;  %v137_v38 = vand.u32 2147483647, %v699_v18  ;;  %v148_v39 = vsub.f32 0.0, %v135_v14 }
  0x3f   :  { %v101_v43 = vmax.f32 %v713_v29, 0.0  ;;  %v102_v44 = vmax.f32 %v715_v30, 0.0  ;;  %v138_v50 = vand.u32 2147483647, %v701_v19  ;;  %v149_v51 = vsub.f32 0.0, %v136_v28  ;;  %v73_v53 = vld [vmem:[#allocation5 + $0x20] sm:$0xff] }
  0x40   :  { %v74_v54 = vld [vmem:[#allocation5 + $0x28] sm:$0xff]  ;;  %v160_v56 = vmul.f32 1.442695, %v147_v34  ;;  %v739_v57 = vadd.s32 %v346_v22, %v681_v8  ;;  %v75_v58 = vld [vmem:[#allocation5 + $0x30] sm:$0xff]  ;;  %v139_v59 = vand.u32 2147483647, %v707_v24  ;;  %v743_v62 = vadd.s32 %v347_v23, %v681_v8 }
  0x41   :  { %v150_v60 = vsub.f32 0.0, %v137_v38  ;;  %v162_v61 = vmul.f32 1.442695, %v148_v39  ;;  %v76_v63 = vld [vmem:[#allocation5 + $0x38] sm:$0xff]  ;;  %v77_v0 = vld [vmem:[#allocation5 + $0x40] sm:$0xff]  ;;  %v108_v4 = vmul.f32 %v69_v41, %v671_v2  ;;  %v109_v10 = vmul.f32 %v70_v42, %v673_v3  ;;  %v78_v22 = vld [vmem:[#allocation5 + $0x48] sm:$0xff] }
  0x42   :  { %v110_v14 = vmul.f32 %v71_v47, %v683_v9  ;;  %v111_v28 = vmul.f32 %v72_v52, %v699_v18  ;;  %v140_v34 = vand.u32 2147483647, %v713_v29  ;;  %v151_v38 = vsub.f32 0.0, %v138_v50  ;;  %v79_v55 = vld [vmem:[#allocation5 + $0x50] sm:$0xff]  ;;  %v80_v2 = vld [vmem:[#allocation5 + $0x58] sm:$0xff]  ;;  %s431_s21 = sshll.u32 %s598_s2, 4  ;;  %s432_s21 = int_to_ptr.vmem [resolvable:$true] %s431_s21 }
  0x43   :  { %v164_v39 = vmul.f32 1.442695, %v149_v51  ;;  %v112_v23 = vmul.f32 %v73_v53, %v701_v19  ;;  %v113_v49 = vmul.f32 %v74_v54, %v707_v24  ;;  %v114_v1 = vmul.f32 %v75_v58, %v713_v29  ;;  %v81_v53 = vld [vmem:[#allocation5 + $0x60] sm:$0xff]  ;;  %s565_s22 = scalar_lea.vmem %s432_s21, 128  ;;  %p570_p11 = scmp.lt.s32.totalorder %s432_s21, %s432_s21 }
  0x44   :  { %447 = vpow2.f32 %v160_v56  ;;  %v141_v41 = vand.u32 2147483647, %v715_v30  ;;  %v152_v42 = vsub.f32 0.0, %v139_v59  ;;  %v166_v47 = vmul.f32 1.442695, %v150_v60  ;;  %p566_p10 = scmp.ne.s32.totalorder %s432_s21, %s565_s22  ;;  %p571_p12 = scmp.lt.s32.totalorder %s565_s22, %s565_s22 }
  0x45   :  { %449 = vpow2.f32 %v162_v61  ;;  %v115_v52 = vmul.f32 %v76_v63, %v715_v30  ;;  %v116_v48 = vmul.f32 %v77_v0, %v717_v31  ;;  %v117_v50 = vmul.f32 %v78_v22, %v721_v35 }
  0x46   :  { %v758_v51 = vsub.f32 %v95_v25, %v108_v4  ;;  %v142_v54 = vand.u32 2147483647, %v717_v31  ;;  %v153_v45 = vsub.f32 0.0, %v140_v34  ;;  %451 = vpow2.f32 %v164_v39  ;;  %p572_p13 = por %p571_p12, %p570_p11 }
  0x47   :  { %v168_v56 = vmul.f32 1.442695, %v151_v38  ;;  %v118_v58 = vmul.f32 %v79_v55, %v723_v36  ;;  %v119_v59 = vmul.f32 %v80_v2, %v727_v40  ;;  %v765_v60 = vsub.f32 %v96_v26, %v109_v10 }
  0x48   :  { %v143_v61 = vand.u32 2147483647, %v721_v35  ;;  %v144_v63 = vand.u32 2147483647, %v723_v36  ;;  %v154_v25 = vsub.f32 0.0, %v141_v41  ;;  %453 = vpow2.f32 %v166_v47  ;;  %p573_p0 = pnand %p572_p13, %p566_p10 }
  0x49   :  { %v170_v0 = vmul.f32 1.442695, %v152_v42  ;;  %v120_v4 = vmul.f32 %v81_v53, %v732_v46  ;;  %v772_v22 = vsub.f32 %v97_v27, %v110_v14  ;;  %v145_v55 = vand.u32 2147483647, %v727_v40 }
  0x4a   :  { %v146_v34 = vand.u32 2147483647, %v732_v46  ;;  %v778_v3 = vsub.f32 %v98_v32, %v111_v28  ;;  %v155_v26 = vsub.f32 0.0, %v142_v54  ;;  %455 = vpow2.f32 %v168_v56 }
  0x4b   :  { %v172_v10 = vmul.f32 1.442695, %v153_v45  ;;  %v782_v38 = vsub.f32 %v99_v33, %v112_v23  ;;  %v786_v9 = vsub.f32 %v100_v37, %v113_v49  ;;  %v790_v27 = vsub.f32 %v101_v43, %v114_v1 }
  0x4c   :  { %v156_v14 = vsub.f32 0.0, %v143_v61  ;;  %v794_v18 = vsub.f32 %v102_v44, %v115_v52  ;;  %v157_v32 = vsub.f32 0.0, %v144_v63  ;;  %457 = vpow2.f32 %v170_v0 }
  0x4d   :  { %v174_v45 = vmul.f32 1.442695, %v154_v25  ;;  %v1083_v19 = vmax.f32 %v717_v31, 0.0  ;;  %v1084_v24 = vmax.f32 %v721_v35, 0.0  ;;  %v158_v29 = vsub.f32 0.0, %v145_v55 }
  0x4e   :  { %v796_v28 = vpop.eup %447  ;;  %v159_v43 = vsub.f32 0.0, %v146_v34  ;;  %v1085_v30 = vmax.f32 %v723_v36, 0.0  ;;  %459 = vpow2.f32 %v172_v10  ;;  %v176_v1 = vmul.f32 1.442695, %v155_v26 }
  0x4f   :  { %v800_v33 = vsub.f32 %v1083_v19, %v116_v48  ;;  %v804_v37 = vsub.f32 %v1084_v24, %v117_v50  ;;  %v806_v49 = vpop.eup %449  ;;  %v348_v39 = vmul.u32 128, %v675_v5  ;;  %v1086_v31 = vmax.f32 %v727_v40, 0.0 }
  0x50   :  { %v810_v44 = vsub.f32 %v1085_v30, %v118_v58  ;;  %v1087_v35 = vmax.f32 %v732_v46, 0.0  ;;  %v178_v2 = vmul.f32 1.442695, %v156_v14  ;;  %v349_v41 = vmul.u32 128, %v677_v6  ;;  %v822_v42 = vpop.eup %451 }
  0x51   :  { %v815_v48 = vsub.f32 %v1086_v31, %v119_v59  ;;  %461 = vpow2.f32 %v174_v45  ;;  %v180_v36 = vmul.f32 1.442695, %v157_v32  ;;  %v186_v47 = vadd.f32 1.0, %v796_v28 }
  0x52   :  { %v819_v23 = vsub.f32 %v1087_v35, %v120_v4  ;;  %v350_v52 = vmul.u32 128, %v679_v7  ;;  %v182_v5 = vmul.f32 1.442695, %v158_v29  ;;  %v184_v50 = vmul.f32 1.442695, %v159_v43  ;;  %v828_v46 = vpop.eup %453 }
  0x53   :  { %v195_v40 = vadd.f32 1.0, %v806_v49  ;;  %v351_v53 = vmul.u32 128, %v686_v11  ;;  %463 = vpow2.f32 %v176_v1  ;;  %v352_v54 = vmul.u32 128, %v688_v12 }
  0x54   :  { %1088 = vst [vmem:[#allocation13_spill] sm:$0xff] %v819_v23  ;;  %v353_v6 = vmul.u32 128, %v690_v13  ;;  %v833_v56 = vadd.s32 %v348_v39, %v681_v8  ;;  %465 = vpow2.f32 %v178_v2  ;;  %v204_v58 = vadd.f32 1.0, %v822_v42  ;;  %v840_v61 = vpop.eup %455 }
  0x55   :  { %v354_v7 = vmul.u32 128, %v693_v15  ;;  %v838_v59 = vadd.s32 %v349_v41, %v681_v8  ;;  %467 = vlog2.f32 %v186_v47  ;;  %v189_v11 = vmul.f32 -0.5, %v796_v28 }
  0x56   :  { %v845_v13 = vadd.s32 %v350_v52, %v681_v8  ;;  %469 = vlog2.f32 %v195_v40  ;;  %v198_v63 = vmul.f32 -0.5, %v806_v49  ;;  %v213_v25 = vadd.f32 1.0, %v828_v46  ;;  %v850_v0 = vpop.eup %457 }
  0x57   :  { %471 = vpow2.f32 %v180_v36  ;;  %v854_v55 = vadd.s32 %v351_v53, %v681_v8  ;;  %v857_v34 = vadd.s32 %v352_v54, %v681_v8  ;;  %v207_v26 = vmul.f32 -0.5, %v822_v42 }
  0x58   :  { %473 = vlog2.f32 %v204_v58  ;;  %v222_v10 = vadd.f32 1.0, %v840_v61  ;;  %v862_v14 = vadd.s32 %v353_v6, %v681_v8  ;;  %v864_v32 = vpop.eup %459  ;;  %v190_v45 = vadd.f32 1.0, %v189_v11 }
  0x59   :  { %475 = vpow2.f32 %v182_v5  ;;  %v192_v19 = vand.u32 2147483647, %v796_v28  ;;  %v201_v24 = vand.u32 2147483647, %v806_v49  ;;  %v199_v29 = vadd.f32 1.0, %v198_v63 }
  0x5a   :  { %477 = vlog2.f32 %v213_v25  ;;  %v231_v43 = vadd.f32 1.0, %v850_v0  ;;  %v870_v30 = vadd.s32 %v354_v7, %v681_v8  ;;  %v210_v39 = vand.u32 2147483647, %v822_v42 }
  0x5b   :  { %v872_v1 = vpop.eup %461  ;;  %479 = vpow2.f32 %v184_v50  ;;  %v216_v31 = vmul.f32 -0.5, %v828_v46  ;;  %v225_v35 = vmul.f32 -0.5, %v840_v61  ;;  %v208_v2 = vadd.f32 1.0, %v207_v26 }
  0x5c   :  { %v219_v41 = vand.u32 2147483647, %v828_v46  ;;  %481 = vlog2.f32 %v222_v10  ;;  %v240_v36 = vadd.f32 1.0, %v864_v32  ;;  %v882_v52 = vmul.f32 %v796_v28, %v190_v45 }
  0x5d   :  { %v879_v47 = vpop.eup %463  ;;  %vm884_vm0 = vcmp.lt.f32.partialorder %v192_v19, 0.0004427343  ;;  %vm888_vm1 = vcmp.lt.f32.partialorder %v201_v24, 0.0004427343  ;;  %v234_v40 = vmul.f32 -0.5, %v850_v0  ;;  %v896_v54 = vmul.f32 %v806_v49, %v199_v29 }
  0x5e   :  { %v893_v53 = vpop.eup %465  ;;  %483 = vlog2.f32 %v231_v43  ;;  %v243_v6 = vmul.f32 -0.5, %v864_v32  ;;  %v249_v28 = vadd.f32 1.0, %v872_v1  ;;  %vm900_vm2 = vcmp.lt.f32.partialorder %v210_v39, 0.0004427343 }
  0x5f   :  { %v468_v58 = vpop.eup %467  ;;  %v217_v11 = vadd.f32 1.0, %v216_v31  ;;  %v226_v63 = vadd.f32 1.0, %v225_v35  ;;  %v228_v25 = vand.u32 2147483647, %v840_v61  ;;  %v906_v10 = vmul.f32 %v822_v42, %v208_v2 }
  0x60   :  { %v470_v26 = vpop.eup %469  ;;  %vm908_vm3 = vcmp.lt.f32.partialorder %v219_v41, 0.0004427343  ;;  %485 = vlog2.f32 %v240_v36  ;;  %v258_v45 = vadd.f32 1.0, %v879_v47  ;;  %v235_v24 = vadd.f32 1.0, %v234_v40 }
  0x61   :  { %v913_v19 = vpop.eup %471  ;;  %v237_v29 = vand.u32 2147483647, %v850_v0  ;;  %v246_v43 = vand.u32 2147483647, %v864_v32  ;;  %v252_v39 = vmul.f32 -0.5, %v872_v1  ;;  %v244_v42 = vadd.f32 1.0, %v243_v6 }
  0x62   :  { %v474_v31 = vpop.eup %473  ;;  %v188_v35 = vmul.f32 0.6931472, %v468_v58  ;;  %487 = vlog2.f32 %v249_v28  ;;  %v267_v2 = vadd.f32 1.0, %v893_v53  ;;  %v197_v36 = vmul.f32 0.6931472, %v470_v26 }
  0x63   :  { %v919_v41 = vpop.eup %475  ;;  %v218_v4 = vmul.f32 %v828_v46, %v217_v11  ;;  %v923_v15 = vmul.f32 %v840_v61, %v226_v63  ;;  %vm925_vm4 = vcmp.lt.f32.partialorder %v228_v25, 0.0004427343  ;;  %v255_v23 = vand.u32 2147483647, %v872_v1 }
  0x64   :  { %v478_v12 = vpop.eup %477  ;;  %489 = vlog2.f32 %v258_v45  ;;  %v261_v6 = vmul.f32 -0.5, %v879_v47  ;;  %v276_v28 = vadd.f32 1.0, %v913_v19  ;;  %v206_v26 = vmul.f32 0.6931472, %v474_v31 }
  0x65   :  { %v932_v58 = vpop.eup %479  ;;  %v935_v46 = vmul.f32 %v850_v0, %v235_v24  ;;  %vm937_vm5 = vcmp.lt.f32.partialorder %v237_v29, 0.0004427343  ;;  %v253_v11 = vadd.f32 1.0, %v252_v39  ;;  %v194_v25 = vsel %vm884_vm0, %v882_v52, %v188_v35 }
  0x66   :  { %v482_v63 = vpop.eup %481  ;;  %v945_v45 = vmul.f32 %v864_v32, %v244_v42  ;;  %vm947_vm6 = vcmp.lt.f32.partialorder %v246_v43, 0.0004427343  ;;  %491 = vlog2.f32 %v267_v2  ;;  %v285_v0 = vadd.f32 1.0, %v919_v41  ;;  %v82_v42 = vld [vmem:[#allocation7] sm:$0xff] }
  0x67   :  { %v203_v24 = vsel %vm888_vm1, %v896_v54, %v197_v36  ;;  %v215_v29 = vmul.f32 0.6931472, %v478_v12  ;;  %v264_v39 = vand.u32 2147483647, %v879_v47  ;;  %v270_v5 = vmul.f32 -0.5, %v893_v53 }
  0x68   :  { %vm386_vm7 = vcmp.lt.s32.totalorder %v739_v57, 208  ;;  %vm387_vm8 = vcmp.lt.s32.totalorder %v743_v62, 208  ;;  %v484_v32 = vpop.eup %483  ;;  %vm959_vm9 = vcmp.lt.f32.partialorder %v255_v23, 0.0004427343  ;;  %v262_v43 = vadd.f32 1.0, %v261_v6 }
  0x69   :  { %493 = vlog2.f32 %v276_v28  ;;  %v294_v31 = vadd.f32 1.0, %v932_v58  ;;  %v212_v12 = vsel %vm900_vm2, %v906_v10, %v206_v26  ;;  %v224_v50 = vmul.f32 0.6931472, %v482_v63  ;;  %v83_v28 = vld [vmem:[#allocation7 + $0x8] sm:$0xff] }
  0x6a   :  { %v968_v54 = vmul.f32 %v872_v1, %v253_v11  ;;  %v279_v35 = vmul.f32 -0.5, %v913_v19  ;;  %vm388_vm10 = vcmp.lt.s32.totalorder %v833_v56, 208  ;;  %v486_v23 = vpop.eup %485  ;;  %v273_v2 = vand.u32 2147483647, %v893_v53 }
  0x6b   :  { %495 = vlog2.f32 %v285_v0  ;;  %v303_v36 = vadd.f32 %v194_v25, %v758_v51  ;;  %v304_v6 = vadd.f32 %v203_v24, %v765_v60  ;;  %v221_v7 = vsel %vm908_vm3, %v218_v4, %v215_v29  ;;  %v84_v60 = vld [vmem:[#allocation7 + $0x10] sm:$0xff] }
  0x6c   :  { %v233_v10 = vmul.f32 0.6931472, %v484_v32  ;;  %vm977_vm11 = vcmp.lt.f32.partialorder %v264_v39, 0.0004427343  ;;  %v271_v26 = vadd.f32 1.0, %v270_v5  ;;  %vm389_vm12 = vcmp.lt.s32.totalorder %v838_v59, 208  ;;  %v488_v11 = vpop.eup %487 }
  0x6d   :  { %v263_v63 = vmul.f32 %v879_v47, %v262_v43  ;;  %v282_v0 = vand.u32 2147483647, %v913_v19  ;;  %497 = vlog2.f32 %v294_v31  ;;  %v305_v51 = vadd.f32 %v212_v12, %v772_v22  ;;  %v85_v43 = vld [vmem:[#allocation7 + $0x18] sm:$0xff] }
  0x6e   :  { %v230_v4 = vsel %vm925_vm4, %v923_v15, %v224_v50  ;;  %v242_v49 = vmul.f32 0.6931472, %v486_v23  ;;  %v280_v25 = vadd.f32 1.0, %v279_v35  ;;  %v288_v24 = vmul.f32 -0.5, %v919_v41  ;;  %v490_v29 = vpop.eup %489 }
  0x6f   :  { %vm989_vm13 = vcmp.lt.f32.partialorder %v273_v2, 0.0004427343  ;;  %v306_v47 = vadd.f32 %v221_v7, %v778_v3  ;;  %v316_v5 = vmul.f32 %v303_v36, %v82_v42  ;;  %v317_v32 = vmul.f32 %v304_v6, %v83_v28  ;;  %v86_v42 = vld [vmem:[#allocation7 + $0x20] sm:$0xff]  ;;  %v87_v6 = vld [vmem:[#allocation7 + $0x28] sm:$0xff] }
  0x70   :  { %v239_v22 = vsel %vm937_vm5, %v935_v46, %v233_v10  ;;  %v251_v40 = vmul.f32 0.6931472, %v488_v11  ;;  %v272_v15 = vmul.f32 %v893_v53, %v271_v26  ;;  %v291_v31 = vand.u32 2147483647, %v919_v41  ;;  %v492_v12 = vpop.eup %491 }
  0x71   :  { %vm999_vm14 = vcmp.lt.f32.partialorder %v282_v0, 0.0004427343  ;;  %v297_v35 = vmul.f32 -0.5, %v932_v58  ;;  %v307_v3 = vadd.f32 %v230_v4, %v782_v38  ;;  %v318_v23 = vmul.f32 %v305_v51, %v84_v60  ;;  %v88_v51 = vld [vmem:[#allocation7 + $0x30] sm:$0xff] }
  0x72   :  { %v248_v46 = vsel %vm947_vm6, %v945_v45, %v242_v49  ;;  %v260_v61 = vmul.f32 0.6931472, %v490_v29  ;;  %v281_v53 = vmul.f32 %v913_v19, %v280_v25  ;;  %v289_v2 = vadd.f32 1.0, %v288_v24  ;;  %v89_v29 = vld [vmem:[#allocation7 + $0x38] sm:$0xff] }
  0x73   :  { %v494_v36 = vpop.eup %493  ;;  %v308_v28 = vadd.f32 %v239_v22, %v786_v9  ;;  %v319_v7 = vmul.f32 %v306_v47, %v85_v43  ;;  %v399_v10 = vsel %vm386_vm7, %v316_v5, 0.0  ;;  %v400_v38 = vsel %vm387_vm8, %v317_v32, 0.0  ;;  %v90_v32 = vld [vmem:[#allocation7 + $0x40] sm:$0xff] }
  0x74   :  { %v257_v20 = vsel %vm959_vm9, %v968_v54, %v251_v40  ;;  %v269_v45 = vmul.f32 0.6931472, %v492_v12  ;;  %vm1017_vm15 = vcmp.lt.f32.partialorder %v291_v31, 0.0004427343  ;;  %v300_v19 = vand.u32 2147483647, %v932_v58 }
  0x75   :  { %v496_v11 = vpop.eup %495  ;;  %v298_v9 = vadd.f32 1.0, %v297_v35  ;;  %v309_v0 = vadd.f32 %v248_v46, %v790_v27  ;;  %v320_v57 = vmul.f32 %v307_v3, %v86_v42  ;;  %v401_v62 = vsel %vm388_vm10, %v318_v23, 0.0  ;;  %v91_v40 = vld [vmem:[#allocation7 + $0x48] sm:$0xff] }
  0x76   :  { %v266_v52 = vsel %vm977_vm11, %v263_v63, %v260_v61  ;;  %v278_v54 = vmul.f32 0.6931472, %v494_v36  ;;  %vm390_vm0 = vcmp.lt.s32.totalorder %v845_v13, 208  ;;  %v412_v60 = vadd.f32 %v400_v38, %v399_v10 }
  0x77   :  { %v498_v4 = vpop.eup %497  ;;  %v290_v49 = vmul.f32 %v919_v41, %v289_v2  ;;  %v310_v25 = vadd.f32 %v257_v20, %v794_v18  ;;  %v321_v24 = vmul.f32 %v308_v28, %v87_v6  ;;  %v402_v27 = vsel %vm389_vm12, %v319_v7, 0.0  ;;  %v1117_v2 = vld [vmem:[#allocation12_spill] sm:$0xff]  ;;  %v1119_v28 = vld [vmem:[#allocation13_spill] sm:$0xff] }
  0x78   :  { %v275_v56 = vsel %vm989_vm13, %v272_v15, %v269_v45  ;;  %v287_v47 = vmul.f32 0.6931472, %v496_v11  ;;  %vm391_vm1 = vcmp.lt.s32.totalorder %v854_v55, 208  ;;  %v413_v1 = vadd.f32 %v412_v60, %v401_v62 }
  0x79   :  { %v299_v13 = vmul.f32 %v932_v58, %v298_v9  ;;  %v311_v63 = vadd.f32 %v266_v52, %v800_v33  ;;  %v322_v5 = vmul.f32 %v309_v0, %v88_v51  ;;  %v403_v41 = vsel %vm390_vm0, %v320_v57, 0.0 }
  0x7a   :  { %v284_v18 = vsel %vm999_vm14, %v281_v53, %v278_v54  ;;  %v296_v59 = vmul.f32 0.6931472, %v498_v4  ;;  %vm392_vm2 = vcmp.lt.s32.totalorder %v857_v34, 208  ;;  %v414_v43 = vadd.f32 %v413_v1, %v402_v27 }
  0x7b   :  { %vm1040_vm3 = vcmp.lt.f32.partialorder %v300_v19, 0.0004427343  ;;  %v312_v55 = vadd.f32 %v275_v56, %v804_v37  ;;  %v323_v22 = vmul.f32 %v310_v25, %v89_v29  ;;  %v404_v58 = vsel %vm391_vm1, %v321_v24, 0.0  ;;  %v92_v37 = vld [vmem:[#allocation7 + $0x50] sm:$0xff] }
  0x7c   :  { %v293_v33 = vsel %vm1017_vm15, %v290_v49, %v287_v47  ;;  %v1115_v15 = vmul.u32 128, %v695_v16  ;;  %vm393_vm4 = vcmp.lt.s32.totalorder %v862_v14, 208  ;;  %v415_v34 = vadd.f32 %v414_v43, %v403_v41 }
  0x7d   :  { %v313_v12 = vadd.f32 %v284_v18, %v810_v44  ;;  %v324_v50 = vmul.f32 %v311_v63, %v90_v32  ;;  %v358_v35 = vmul.u32 128, %v705_v21  ;;  %v405_v3 = vsel %vm392_vm2, %v322_v5, 0.0  ;;  %v93_v44 = vld [vmem:[#allocation7 + $0x58] sm:$0xff] }
  0x7e   :  { %v382_v31 = vadd.s32 %v1115_v15, %v681_v8  ;;  %v302_v23 = vsel %vm1040_vm3, %v299_v13, %v296_v59  ;;  %v1116_v42 = vmul.u32 128, %v697_v17  ;;  %vm394_vm5 = vcmp.lt.s32.totalorder %v870_v30, 208  ;;  %v94_v17 = vld [vmem:[#allocation7 + $0x60] sm:$0xff] }
  0x7f   :  { %v416_v16 = vadd.f32 %v415_v34, %v404_v58  ;;  %v314_v14 = vadd.f32 %v293_v33, %v815_v48  ;;  %v325_v61 = vmul.f32 %v312_v55, %v91_v40  ;;  %v406_v53 = vsel %vm393_vm4, %v323_v22, 0.0 }
  0x80   :  { %v383_v46 = vadd.s32 %v1116_v42, %v681_v8  ;;  %v1118_v21 = vmul.u32 128, %v1117_v2  ;;  %vm395_vm6 = vcmp.lt.s32.totalorder %v382_v31, 208  ;;  %v315_v7 = vadd.f32 %v302_v23, %v1119_v28 }
  0x81   :  { %v417_v6 = vadd.f32 %v416_v16, %v405_v3  ;;  %v326_v10 = vmul.f32 %v313_v12, %v92_v37  ;;  %v407_v38 = vsel %vm394_vm5, %v324_v50, 0.0  ;;  %v385_v20 = vadd.s32 %v358_v35, %v681_v8 }
  0x82   :  { %v384_v36 = vadd.s32 %v1118_v21, %v681_v8  ;;  %vm396_vm7 = vcmp.lt.s32.totalorder %v383_v46, 208  ;;  %v327_v45 = vmul.f32 %v314_v14, %v93_v44  ;;  %v408_v48 = vsel %vm395_vm6, %v325_v61, 0.0 }
  0x83   :  { %v418_v30 = vadd.f32 %v417_v6, %v406_v53  ;;  %v328_v19 = vmul.f32 %v315_v7, %v94_v17  ;;  %v409_v11 = vsel %vm396_vm7, %v326_v10, 0.0  ;;  %vm398_vm9 = vcmp.lt.s32.totalorder %v385_v20, 208 }
  0x84   :  { %vm397_vm8 = vcmp.lt.s32.totalorder %v384_v36, 208 }
  0x85   :  { %v419_v26 = vadd.f32 %v418_v30, %v407_v38  ;;  %v410_v0 = vsel %vm397_vm8, %v327_v45, 0.0  ;;  %v411_v62 = vsel %vm398_vm9, %v328_v19, 0.0 }
  0x87   :  { %v420_v9 = vadd.f32 %v419_v26, %v408_v48 }
  0x89   :  { %v421_v57 = vadd.f32 %v420_v9, %v409_v11 }
  0x8b   :  { %v422_v51 = vadd.f32 %v421_v57, %v410_v0 }
  0x8d   :  { %v423_v52 = vadd.f32 %v422_v51, %v411_v62 }
  0x8f   :  { %424 = vst [vmem:[#allocation8] sm:$0xff] %v423_v52 }
  0x90   :  { %576 = shalt.err (!%p573_p0)
}
  0x91   :  { %s577_s25 = scalar_lea.hbm %s1080_s3, 128 }
  0x92   :  { %p578_p1 = scmp.ne.s32.totalorder %s1080_s3, %s577_s25  ;;  %p581_p2 = scmp.lt.u32.totalorder %s577_s25, %s1080_s3 }
  0x94   :  { %p583_p3 = pnand %p581_p2, %p578_p1 }
  0x96   :  { %586 = shalt.err (!%p583_p3)
}
  0x97   :  { %434 = dma.vmem_to_hbm [thread:$0]  %s432_s21, 128, %s1080_s3, [#allocation4]  }
  0x98   :  { %591 = dma.done.wait [#allocation4], 128  }
  0x99   :  { %592 = vsyncadd [#allocation4], 4294967168 }
  0x9a   :  { %438 = vsyncpa [#allocation3], 1 }
  0x9b   :  { %439 = vsyncpa [#allocation6], 1 }
  0x9c   :  { %440 = vsyncpa [#allocation4], 1 }

</bundles_post_ra>
